<compile_context>
chip_gen: v7x
topology: tpu7x:2x2x1
jax: 0.10.0
libtpu: 0.0.40
codegen_flags: <defaults>
</compile_context>

<pallas_src>
import functools

import jax
import jax.numpy as jnp
from jax.experimental import pallas as pl
from jax.experimental.pallas import tpu as pltpu


def _divide_audio_kernel(x_ref, o_ref, *, fill, row, lane_start):
    # o_ref: (bt, e, C) output block;  x_ref: (bt, 1, needed) input-prefix block.
    # 1) splat the fill value over the whole block (pure store stream),
    # 2) overwrite the trailing `needed` lanes of row `row` with the input
    #    prefix (tiny masked store; re-writing those few lanes is negligible).
    o_ref[...] = jnp.full(o_ref.shape, fill, o_ref.dtype)
    o_ref[:, row:row + 1, lane_start:] = x_ref[...].astype(o_ref.dtype)


def _round_up(x, m):
    return (x + m - 1) // m * m


def _vmem_tile_bytes(rows, cols, itemsize):
    """VMEM bytes of one (rows, cols) tile after (sublane, lane) padding."""
    rows_per_sublane = max(4 // max(itemsize, 1), 1)      # f32:1, bf16:2, int8:4
    padded_rows = _round_up(max(rows, 1), 8 * rows_per_sublane)
    return padded_rows * _round_up(max(cols, 1), 128) * itemsize


def _probably_two_tensorcores():
    # v7x is the only generation with 2 TensorCores per chip; it is also the
    # only one with 64 MiB VMEM per core (v5e/v6e: 128 MiB).  Heuristic only and
    # fail-safe: getting it wrong merely halves the batch tile.
    try:
        return int(pltpu.get_tpu_info().vmem_capacity_bytes) <= (64 << 20)
    except Exception:
        return False


_VMEM_LIMIT_BYTES = 48 << 20        # <= 64 MiB physical VMEM on every generation
_DEFAULT_VMEM_BUDGET = 36 << 20     # budget for double-buffered (in + out) blocks


def divide_audio(x, crop_size, pad_if_needed=True, fill=0,
                 padding_mode='constant',
                 vmem_budget_bytes=_DEFAULT_VMEM_BUDGET):
    """Pallas port of DivideAudio.forward.

    x: (batch, width).  Returns the stacked (batch, elements_per_file,
    crop_size) array; out[i] equals the i-th tensor of the PyTorch module's
    returned list.
    """
    assert padding_mode == 'constant'  # TODO(synk): only constant padding_mode supported
    assert pad_if_needed               # TODO(synk): module returns an empty list when False
    batch, width = x.shape
    # TODO(synk): crop_size > width yields a ragged short row (vstack of one
    # length-`width` slice) in the original module; not handled here.
    assert crop_size <= width

    e = width // crop_size + 1                 # elements_per_file
    left_pad = width * e - width               # F.pad(pad=[left_pad, 0])
    out_len = e * crop_size
    needed = max(out_len - left_pad, 0)        # input samples that reach the output
    dtype = x.dtype
    itemsize = dtype.itemsize

    if needed == 0:
        # The left pad covers the entire output: pure constant, no Pallas launch,
        # no VMEM staging, and XLA can fuse it straight into the consumer.
        return jnp.full((batch, e, crop_size), fill, dtype)

    # needed > 0  <=>  width // crop_size == 1, hence e == 2 and needed <= crop;
    # all real data lands in the tail of the LAST row.
    row = e - 1
    lane_start = crop_size - needed            # == width - crop_size

    # ---- batch tile: biggest block whose double-buffered (in + out) VMEM
    # footprint -- including (sublane, lane) tile padding -- fits the budget.
    out_row_vmem = _vmem_tile_bytes(e, crop_size, itemsize)
    in_row_vmem = _vmem_tile_bytes(1, needed, itemsize)
    per_row_vmem = 2 * (out_row_vmem + in_row_vmem)        # double-buffered
    bt = max(min(vmem_budget_bytes // per_row_vmem, batch), 1)
    # TODO(synk): a crop_size so large that even a (1, e, crop_size) block blows
    # the VMEM limit would additionally need lane (crop) tiling; not implemented.
    if _probably_two_tensorcores() and batch >= 2 and bt >= batch:
        bt = (batch + 1) // 2                  # >= 2 parallel grid steps for the 2 TCs

    grid = (pl.cdiv(batch, bt),)

    # Only the input prefix that actually reaches the output is handed to the
    # kernel (tiny wrapper-side slice; keeps the kernel's HBM reads minimal).
    x_prefix = x[:, :needed].reshape(batch, 1, needed)

    out_bytes = batch * out_len * itemsize
    in_bytes = batch * needed * itemsize

    out = pl.pallas_call(
        functools.partial(_divide_audio_kernel, fill=fill, row=row,
                          lane_start=lane_start),
        out_shape=jax.ShapeDtypeStruct((batch, e, crop_size), dtype),
        grid=grid,
        # Input block: last two dims equal the full array dims -> always legal.
        in_specs=[pl.BlockSpec((bt, 1, needed), lambda b: (b, 0, 0))],
        # Output block: (e, crop_size) equal the full array dims -> always legal,
        # and the kernel emits the final 3-D layout directly (no wrapper reshape).
        out_specs=pl.BlockSpec((bt, e, crop_size), lambda b: (b, 0, 0)),
        compiler_params=pltpu.CompilerParams(
            dimension_semantics=("parallel",),
            vmem_limit_bytes=_VMEM_LIMIT_BYTES),
        cost_estimate=pl.CostEstimate(
            flops=0, transcendentals=0, bytes_accessed=out_bytes + in_bytes),
    )(x_prefix)
    return out


def divide_audio_ref(x, crop_size, fill=0):
    """Pure-JAX reference mirroring the PyTorch loop (stacked over batch)."""
    batch, width = x.shape
    e = width // crop_size + 1
    left_pad = width * e - width
    outs = []
    for i in range(batch):
        padded = jnp.concatenate([jnp.full((left_pad,), fill, x.dtype), x[i]])
        rows = [padded[j * crop_size:(j + 1) * crop_size] for j in range(e)]
        outs.append(jnp.stack(rows))
    return jnp.stack(outs)


def _check(x, crop, **kw):
    out = jax.block_until_ready(divide_audio(x, crop, **kw))
    ref = divide_audio_ref(x, crop, fill=kw.get('fill', 0))
    assert out.shape == ref.shape, (out.shape, ref.shape)
    assert out.dtype == ref.dtype, (out.dtype, ref.dtype)
    assert jnp.allclose(out.astype(jnp.float32), ref.astype(jnp.float32)), \
        "mismatch vs reference"


if __name__ == "__main__":
    key = jax.random.PRNGKey(0)
    k1, k2, k3, k4 = jax.random.split(key, 4)

    # 1) crop <= width < 2*crop: data path (e=2, a 4-sample prefix reaches the output).
    _check(jax.random.normal(k1, (2, 16), dtype=jnp.float32), 10)

    # 2) width >= 2*crop: the left pad covers everything -> pure-fill (no Pallas) path.
    _check(jax.random.normal(k2, (8, 32), dtype=jnp.float32), 10)

    # 3) non-divisible batch with a tiny VMEM budget: multi-step grid (bt=2 over
    #    batch=9) with a partial final batch block; needed_prefix=1.
    _check(jax.random.normal(k3, (9, 19), dtype=jnp.float32), 10,
           vmem_budget_bytes=40_000)

    # 4) width == crop: the whole input becomes the last row (lane_start=0).
    _check(jax.random.normal(k4, (3, 10), dtype=jnp.float32), 10)

    print("KERNEL_OK")
</pallas_src>

<mosaic_0001>
module attributes {stable_mosaic.version = 11 : i64} {
  func.func @_divide_audio_kernel(%arg0: i32, %arg1: memref<2x1x4xf32, #tpu.memory_space<vmem>>, %arg2: memref<2x2x10xf32, #tpu.memory_space<vmem>>) attributes {dimension_semantics = [#tpu.dimension_semantics<parallel>], iteration_bounds = array<i64: 1>, scalar_prefetch = 0 : i64, scratch_operands = 0 : i64, tpu.core_type = #tpu.core_type<tc>, window_params = [{transform_indices = @transform_0, window_bounds = array<i64: 2, 1, 4>}, {transform_indices = @transform_1, window_bounds = array<i64: 2, 2, 10>}]} {
    %cst = arith.constant 0.000000e+00 : f32
    %0 = vector.broadcast %cst : f32 to vector<2x2x10xf32>
    %c0 = arith.constant 0 : index
    %c0_0 = arith.constant 0 : index
    %c0_1 = arith.constant 0 : index
    %1 = vector.load %arg2[%c0, %c0_0, %c0_1] : memref<2x2x10xf32, #tpu.memory_space<vmem>>, vector<2x2x10xf32>
    tpu.vector_store %arg2[%c0, %c0_0, %c0_1], %0 {strides = array<i32>} : memref<2x2x10xf32, #tpu.memory_space<vmem>>, vector<2x2x10xf32>,
    %c0_2 = arith.constant 0 : index
    %c0_3 = arith.constant 0 : index
    %c0_4 = arith.constant 0 : index
    %2 = vector.load %arg1[%c0_2, %c0_3, %c0_4] : memref<2x1x4xf32, #tpu.memory_space<vmem>>, vector<2x1x4xf32>
    %c0_5 = arith.constant 0 : index
    %c1 = arith.constant 1 : index
    %c6 = arith.constant 6 : index
    %3 = vector.load %arg2[%c0_5, %c1, %c6] : memref<2x2x10xf32, #tpu.memory_space<vmem>>, vector<2x1x4xf32>
    tpu.vector_store %arg2[%c0_5, %c1, %c6], %2 {strides = array<i32>} : memref<2x2x10xf32, #tpu.memory_space<vmem>>, vector<2x1x4xf32>,
    return
  }
  func.func @transform_0(%arg0: i32) -> (i32, i32, i32) {
    %c0_i32 = arith.constant 0 : i32
    %c0_i32_0 = arith.constant 0 : i32
    %c0_i32_1 = arith.constant 0 : i32
    return %arg0, %c0_i32, %c0_i32_0 : i32, i32, i32
  }
  func.func @transform_1(%arg0: i32) -> (i32, i32, i32) {
    %c0_i32 = arith.constant 0 : i32
    %c0_i32_0 = arith.constant 0 : i32
    %c0_i32_1 = arith.constant 0 : i32
    return %arg0, %c0_i32, %c0_i32_0 : i32, i32, i32
  }
}

</mosaic_0001>

<bundles_post_ra>
// kernel: tpu_custom_call.1
= control target key start
LH: loop header
LB: loop body
LE: loop exit
PB: predicated region body
PF: predicated region fallthrough
CT: control target
= control target key end

     0   :  { %6 = vsyncpa [#allocation3], 0  ;;  %s164_s0 = inlined_call_operand.hbm [shape: f32[2,1,4], index: 0, kind: input, shape index: {}]   ;;  %s165_s1 = inlined_call_operand.hbm [shape: f32[2,2,10], index: 1, kind: output, shape index: {}]  }
   0x1   :  { %7 = vsyncpa [#allocation4], 0  ;;  %s122_s6 = smov [#allocation2]   ;;  %s74_s10 = scalar_lea.hbm %s164_s0, 32 }
   0x2   :  { %s13_s7 = sshll.u32 %s122_s6, 4  ;;  %p75_p0 = scmp.ne.s32.totalorder %s164_s0, %s74_s10  ;;  %s14_s7 = int_to_ptr.vmem [resolvable:$true] %s13_s7 }
   0x3   :  { %p78_p1 = scmp.lt.u32.totalorder %s74_s10, %s164_s0 }
   0x5   :  { %p80_p2 = pnand %p78_p1, %p75_p0 }
   0x7   :  { %83 = shalt.err (!%p80_p2)
}
   0x8   :  { %s84_s15 = scalar_lea.vmem %s14_s7, 32  ;;  %p89_p4 = scmp.lt.s32.totalorder %s14_s7, %s14_s7 }
   0x9   :  { %p85_p3 = scmp.ne.s32.totalorder %s14_s7, %s84_s15  ;;  %p90_p5 = scmp.lt.s32.totalorder %s84_s15, %s84_s15 }
   0xb   :  { %p91_p6 = por %p90_p5, %p89_p4 }
   0xd   :  { %p92_p7 = pnand %p91_p6, %p85_p3 }
   0xf   :  { %95 = shalt.err (!%p92_p7)
}
  0x10   :  { %s123_s16 = smov 16   ;;  %s124_s17 = smov 1  }
  0x11   :  { %19 = dma.hbm_to_vmem [thread:$0]  %s164_s0, 32, %s14_s7, [#allocation3], %s123_s16, %s123_s16, %s124_s17  }
  0x12   :  { %118 = dma.done.wait [#allocation3], 32  }
  0x13   :  { %119 = vsyncadd [#allocation3], 4294967264  ;;  %vm23_vm0 = vcmask 74752   ;;  %v125_v0 = vmov 0.0   ;;  %v64_v1 = vld [vmem:[#allocation2] ss:$0 sm:$0xff] }
  0x14   :  { %24 = vst.msk [vmem:[#allocation5] sm:$0x3] %vm23_vm0, %v125_v0  ;;  %25 = vst.msk [vmem:[#allocation5 + $0x2] sm:$0x3] %vm23_vm0, %v125_v0  ;;  %s126_s20 = smov 6   ;;  %vm44_vm1 = vcmask 73776  }
  0x15   :  { %38 = vrot.lane.b32.xlu0 %v64_v1, %s126_s20  ;;  %v65_v2 = vld [vmem:[#allocation2 + $0x1] ss:$0 sm:$0xff]  ;;  %s127_s21 = smov [#allocation5]  }
  0x16   :  { %s52_s22 = sshll.u32 %s127_s21, 4  ;;  %s53_s22 = int_to_ptr.vmem [resolvable:$true] %s52_s22 }
  0x17   :  { %s96_s0 = scalar_lea.vmem %s53_s22, 64  ;;  %p101_p9 = scmp.lt.s32.totalorder %s53_s22, %s53_s22 }
  0x18   :  { %p97_p8 = scmp.ne.s32.totalorder %s53_s22, %s96_s0  ;;  %p102_p10 = scmp.lt.s32.totalorder %s96_s0, %s96_s0 }
  0x19   :  { %40 = vrot.lane.b32.xlu0 %v65_v2, %s126_s20 }
  0x1a   :  { %p103_p11 = por %p102_p10, %p101_p9 }
  0x1c   :  { %p104_p12 = pnand %p103_p11, %p97_p8 }
  0x87   :  { %v39_v3 = vpop.permute.xlu0 %38 }
  0x88   :  { %45 = vst.msk [vmem:[#allocation5 + $0x1] sm:$0x1] %vm44_vm1, %v39_v3 }
  0x8b   :  { %v41_v4 = vpop.permute.xlu0 %40 }
  0x8c   :  { %46 = vst.msk [vmem:[#allocation5 + $0x3] sm:$0x1] %vm44_vm1, %v41_v4 }
  0x8d   :  { %107 = shalt.err (!%p104_p12)
}
  0x8e   :  { %s108_s25 = scalar_lea.hbm %s165_s1, 64 }
  0x8f   :  { %p109_p13 = scmp.ne.s32.totalorder %s165_s1, %s108_s25  ;;  %p112_p0 = scmp.lt.u32.totalorder %s108_s25, %s165_s1 }
  0x91   :  { %p114_p1 = pnand %p112_p0, %p109_p13 }
  0x93   :  { %117 = shalt.err (!%p114_p1)
}
  0x94   :  { %s128_s30 = smov 32   ;;  %s129_s2 = smov 2  }
  0x95   :  { %58 = dma.vmem_to_hbm [thread:$0]  %s53_s22, 64, %s165_s1, [#allocation4], %s128_s30, %s128_s30, %s129_s2  }
  0x96   :  { %120 = dma.done.wait [#allocation4], 64  }
  0x97   :  { %121 = vsyncadd [#allocation4], 4294967232 }
  0x98   :  { %62 = vsyncpa [#allocation3], 1 }
  0x99   :  { %63 = vsyncpa [#allocation4], 1 }

</bundles_post_ra>
